<compile_context>
chip_gen: v6e
topology: v6e:2x2x1
jax: 0.10.0
libtpu: 0.0.40
codegen_flags: <defaults>
</compile_context>

<pallas_src>
import math

import jax
import jax.numpy as jnp
from jax.experimental import pallas as pl
from jax.experimental.pallas import tpu as pltpu


# ---------------------------------------------------------------------------
# Hardware-aware knobs
# ---------------------------------------------------------------------------
def _device_kind():
    try:
        return jax.devices()[0].device_kind.lower()
    except Exception:
        return ""


def _hw_params():
    kind = _device_kind()
    if "v7" in kind:
        # 64 MiB VMEM / TC, 256-wide MXU, 2 TensorCores per chip.
        return dict(vmem_budget=40 << 20, mxu_m=256, two_tc=True)
    if "v5" in kind:
        # 128 MiB VMEM, 128x128 MXU, 1 TC.
        return dict(vmem_budget=80 << 20, mxu_m=128, two_tc=False)
    # v6e default: 128 MiB VMEM, 256-wide MXU, 1 TC.
    return dict(vmem_budget=80 << 20, mxu_m=256, two_tc=False)


# ---------------------------------------------------------------------------
# Kernel 1: flattened linear projection  y = x2d @ W + b   (bf16 MXU, f32 acc)
# Used for the hoisted kx projection and for the attn1 `scalar` projection.
# ---------------------------------------------------------------------------
def _linear_kernel(x_ref, w_ref, b_ref, o_ref):
    y = jnp.dot(x_ref[...], w_ref[...], preferred_element_type=jnp.float32)
    o_ref[...] = (y + b_ref[...]).astype(o_ref.dtype)


def _linear(x2d, w, b, *, out_dtype, row_tile=512):
    """x2d: (M, E) bf16, w: (E, H) bf16, b: (1, H) f32 -> (M, H) out_dtype."""
    M, E = x2d.shape
    H = w.shape[1]
    tm = M if M <= row_tile else row_tile
    if tm < M:
        tm = max(8, (tm // 8) * 8)
    return pl.pallas_call(
        _linear_kernel,
        out_shape=jax.ShapeDtypeStruct((M, H), out_dtype),
        grid=(pl.cdiv(M, tm),),
        in_specs=[
            pl.BlockSpec((tm, E), lambda i: (i, 0)),
            pl.BlockSpec((E, H), lambda i: (0, 0)),
            pl.BlockSpec((1, H), lambda i: (0, 0)),
        ],
        out_specs=pl.BlockSpec((tm, H), lambda i: (i, 0)),
        compiler_params=pltpu.CompilerParams(
            dimension_semantics=("parallel",)),
    )(x2d, w, b)


# ---------------------------------------------------------------------------
# Kernel 2: Attention (dot_product, n_head=1) — (q tile) x (K tile) grid.
# ---------------------------------------------------------------------------
def _attention_kernel(q_ref, kxT_ref, kx_ref, wq_ref, bq_ref, wp_ref, bp_ref,
                      out_ref, score_ref, qx_ref, acc_ref):
    k_step = pl.program_id(1)
    nk = pl.num_programs(1)
    B, TQ, E = q_ref.shape
    H = wq_ref.shape[1]
    OD = wp_ref.shape[1]

    # qx projection done once per q tile (k_step == 0), batch folded into M,
    # bf16 operands with f32 accumulation, result stashed in a bf16 scratch.
    @pl.when(k_step == 0)
    def _():
        qx = jnp.dot(q_ref[...].reshape(B * TQ, E), wq_ref[...],
                     preferred_element_type=jnp.float32) + bq_ref[...]
        qx_ref[...] = qx.reshape(B, TQ, H).astype(jnp.bfloat16)
        acc_ref[...] = jnp.zeros_like(acc_ref)

    qx = qx_ref[...]                 # (B, TQ, H) bf16
    kxT = kxT_ref[...]               # (B, H, TK) bf16 (pre-transposed once)
    kx = kx_ref[...]                 # (B, TK, H) bf16

    # score = bmm(qx, kx^T): contraction on the RHS sublane dim -> no
    # per-tile XLU transpose of kx.  bf16 operands, f32 accumulation.
    score = jnp.einsum('bqh,bhk->bqk', qx, kxT,
                       preferred_element_type=jnp.float32)

    # softmax over dim 0 (batch axis) == F.softmax(score, dim=0).
    # Each K tile is independent (softmax is not over K), so no online pass.
    m = jnp.max(score, axis=0, keepdims=True)
    e = jnp.exp(score - m)
    denom = jnp.sum(e, axis=0, keepdims=True)
    p = e / denom                    # exact divide: stored score is normalised
    score_ref[...] = p.astype(score_ref.dtype)

    # ctx accumulation across K tiles (f32 scratch).
    acc_ref[...] += jnp.einsum('bqk,bkh->bqh', p.astype(jnp.bfloat16), kx,
                               preferred_element_type=jnp.float32)

    # Final projection on the last K step; dropout(p=0) is the identity.
    @pl.when(k_step == nk - 1)
    def _():
        ctx = acc_ref[...].reshape(B * TQ, H).astype(jnp.bfloat16)
        out = jnp.dot(ctx, wp_ref[...],
                      preferred_element_type=jnp.float32) + bp_ref[...]
        out_ref[...] = out.reshape(B, TQ, OD).astype(out_ref.dtype)


# ---------------------------------------------------------------------------
# Tile / VMEM budgeting
# ---------------------------------------------------------------------------
def _pick_k_tile(K, k_tile, cap=1024):
    """K tile must be a multiple of 128 that divides K (or K itself)."""
    tk = int(k_tile) if k_tile is not None else min(K, cap)
    if tk >= K:
        return K
    tk = max(128, (tk // 128) * 128)
    while tk > 128 and (K % tk or tk % 128):
        tk -= 128
    return tk if (tk >= 128 and K % tk == 0) else K


def _pick_q_tile(B, Q, E, H, OD, TK, q_tile, hw):
    budget, mxu_m, two_tc = hw["vmem_budget"], hw["mxu_m"], hw["two_tc"]
    # Resident (constant index_map) inputs are still DOUBLE-buffered by the
    # pipeliner -> count them x2 (review feedback, matters on v7x 64 MiB/TC).
    resident = 2 * (E * H * 2 + H * 4 + H * OD * 2 + OD * 4)
    # kx / kxT stream along the K axis (bf16, double-buffered).
    kv_stream = 2 * 2 * (B * TK * H * 2)
    # Per q-row: streamed q (bf16) / out (f32) / score (bf16) blocks (x2 buf),
    # persistent qx (bf16) + acc (f32) scratch, and the f32 working set.
    per_row = (2 * B * E * 2 + 2 * B * OD * 4 + 2 * B * TK * 2
               + B * H * (2 + 4) + B * (3 * TK + H + OD) * 4)

    if q_tile is not None:
        tq = min(int(q_tile), Q)
        if tq < Q:
            tq = max(8, (tq // 8) * 8)
    else:
        avail = max(budget - resident - kv_stream, per_row * 8)
        tq = min(int(avail // per_row), Q)
        if tq < Q:
            if Q >= mxu_m:
                tq = min(Q, max(mxu_m, (tq // mxu_m) * mxu_m))
            else:
                tq = max(8, (tq // 8) * 8)
    # v7x (2 TCs): keep the parallel q axis >= 2 steps so both cores are used.
    if two_tc and Q >= 2 * mxu_m and tq > Q // 2:
        tq = max(mxu_m, ((Q // 2) // mxu_m) * mxu_m)
    tq = min(tq, Q)

    est = resident + kv_stream + per_row * tq
    vmem_limit = int(min(budget, max(4 * est, 64 << 20)))
    return tq, vmem_limit


# ---------------------------------------------------------------------------
# Wrapper mirroring Attention.forward (dot_product, n_head=1)
# ---------------------------------------------------------------------------
def attention_forward(k, q, params, *, n_head=1, q_tile=None, k_tile=None):
    if q.ndim == 2:
        q = q[:, None, :]
    if k.ndim == 2:
        k = k[:, None, :]
    assert n_head == 1, "kernel specialized to n_head=1 (module default)"

    B, K, E = k.shape
    _, Q, _ = q.shape

    # PyTorch (out, in) weights -> (in, out), cast to bf16 ONCE in the wrapper.
    wk_t = params['w_k_weight'].T.astype(jnp.bfloat16)     # (E, H)
    wq_t = params['w_q_weight'].T.astype(jnp.bfloat16)     # (E, H)
    wp_t = params['proj_weight'].T.astype(jnp.bfloat16)    # (H, OD)
    bk = params['w_k_bias'].reshape(1, -1).astype(jnp.float32)
    bq = params['w_q_bias'].reshape(1, -1).astype(jnp.float32)
    bp = params['proj_bias'].reshape(1, -1).astype(jnp.float32)
    H = wk_t.shape[1]
    OD = wp_t.shape[1]

    # kx projection hoisted out of the grid: one flattened bf16 MXU matmul.
    kx = _linear(k.reshape(B * K, E).astype(jnp.bfloat16), wk_t, bk,
                 out_dtype=jnp.bfloat16).reshape(B, K, H)
    # kx^T materialised once (one XLA transpose) instead of per-q-tile.
    kxT = jnp.swapaxes(kx, 1, 2)                            # (B, H, K) bf16

    hw = _hw_params()
    TK = _pick_k_tile(K, k_tile)
    TQ, vmem_limit = _pick_q_tile(B, Q, E, H, OD, TK, q_tile, hw)
    grid = (pl.cdiv(Q, TQ), pl.cdiv(K, TK))

    q_bf16 = q.astype(jnp.bfloat16)                         # stream q in bf16

    out, score = pl.pallas_call(
        _attention_kernel,
        out_shape=(
            jax.ShapeDtypeStruct((B, Q, OD), jnp.float32),
            jax.ShapeDtypeStruct((B, Q, K), jnp.bfloat16),  # bf16 score store
        ),
        grid=grid,
        in_specs=[
            pl.BlockSpec((B, TQ, E), lambda i, kk: (0, i, 0)),   # q tile
            pl.BlockSpec((B, H, TK), lambda i, kk: (0, 0, kk)),  # kx^T tile
            pl.BlockSpec((B, TK, H), lambda i, kk: (0, kk, 0)),  # kx tile
            pl.BlockSpec((E, H), lambda i, kk: (0, 0)),          # wq (resident)
            pl.BlockSpec((1, H), lambda i, kk: (0, 0)),          # bq
            pl.BlockSpec((H, OD), lambda i, kk: (0, 0)),         # wp (resident)
            pl.BlockSpec((1, OD), lambda i, kk: (0, 0)),         # bp
        ],
        out_specs=(
            pl.BlockSpec((B, TQ, OD), lambda i, kk: (0, i, 0)),  # out (K-resident)
            pl.BlockSpec((B, TQ, TK), lambda i, kk: (0, i, kk)), # score
        ),
        scratch_shapes=[
            pltpu.VMEM((B, TQ, H), jnp.bfloat16),   # qx stash
            pltpu.VMEM((B, TQ, H), jnp.float32),    # ctx accumulator
        ],
        compiler_params=pltpu.CompilerParams(
            dimension_semantics=("parallel", "arbitrary"),
            vmem_limit_bytes=vmem_limit),
    )(q_bf16, kxT, kx, wq_t, bq, wp_t, bp)
    return out, score


# ---------------------------------------------------------------------------
# Kernel 3: MaskedEdgeAttention attn1 — softmax(dim=0) + edge mask + renorm.
# Everything kept in (S, B, max_seq_len) layout so reductions run over the
# leading (cheap, non-lane) axis; wrapper transposes to (B, max_seq_len, S).
# ---------------------------------------------------------------------------
def _attn1_scores_kernel(scale_ref, mask_ref, maskc_ref, scores_ref):
    s = scale_ref[...]                                     # (S, B, Mx) f32
    m = jnp.max(s, axis=0, keepdims=True)
    e = jnp.exp(s - m)
    alpha = e / jnp.sum(e, axis=0, keepdims=True)          # softmax over dim 0
    masked = alpha * mask_ref[...]
    sums = jnp.sum(masked, axis=0, keepdims=True)
    scores_ref[...] = (masked / sums) * maskc_ref[...]


def _build_edge_masks(edge_ind, batch, max_seq_len, seq_len):
    """mask = 1e-10 everywhere, 1 at edges; mask_copy = 0/1.  (B, Mx, S)."""
    idx = [[i, int(x[0]), int(x[1])] for i, edges in enumerate(edge_ind)
           for x in edges]
    mask = jnp.full((batch, max_seq_len, seq_len), 1e-10, jnp.float32)
    mask_copy = jnp.zeros((batch, max_seq_len, seq_len), jnp.float32)
    if idx:
        idx = jnp.asarray(idx, dtype=jnp.int32)
        mask = mask.at[idx[:, 0], idx[:, 1], idx[:, 2]].set(1.0)
        mask_copy = mask_copy.at[idx[:, 0], idx[:, 1], idx[:, 2]].set(1.0)
    return mask, mask_copy


def masked_edge_attention_forward(M, scalar_weight, edge_ind, lengths=None):
    """M: (seq_len, batch, input_dim); scalar_weight: (max_seq_len, input_dim).
    Returns scores: (batch, max_seq_len, seq_len) — attn_type='attn1'."""
    del lengths  # unused by the attn1 branch, kept for signature parity
    S, B, D = M.shape
    Mx = scalar_weight.shape[0]

    # scale = self.scalar(M): flattened bf16 MXU matmul (bias-free Linear).
    wt = scalar_weight.T.astype(jnp.bfloat16)               # (D, Mx)
    zero_b = jnp.zeros((1, Mx), jnp.float32)
    scale = _linear(M.reshape(S * B, D).astype(jnp.bfloat16), wt, zero_b,
                    out_dtype=jnp.float32).reshape(S, B, Mx)

    # TODO(synk): the edge_ind -> mask scatter (irregular Python index list)
    # stays host-side; only the dense math is fused into the kernel.
    mask_bms, maskc_bms = _build_edge_masks(edge_ind, B, Mx, S)
    mask_sbm = jnp.transpose(mask_bms, (2, 0, 1))
    maskc_sbm = jnp.transpose(maskc_bms, (2, 0, 1))

    scores_sbm = pl.pallas_call(
        _attn1_scores_kernel,
        out_shape=jax.ShapeDtypeStruct((S, B, Mx), jnp.float32),
        grid=(1,),
        in_specs=[pl.BlockSpec((S, B, Mx), lambda i: (0, 0, 0)),
                  pl.BlockSpec((S, B, Mx), lambda i: (0, 0, 0)),
                  pl.BlockSpec((S, B, Mx), lambda i: (0, 0, 0))],
        out_specs=pl.BlockSpec((S, B, Mx), lambda i: (0, 0, 0)),
    )(scale, mask_sbm, maskc_sbm)
    return jnp.transpose(scores_sbm, (1, 2, 0))              # (B, Mx, S)


# ---------------------------------------------------------------------------
# Parameter init (shapes match the PyTorch module) and pure-JAX references
# ---------------------------------------------------------------------------
def init_params(key, embed_dim, hidden_dim, out_dim, n_head=1):
    ks = jax.random.split(key, 6)

    def lin(wkey, bkey, fan_in, fan_out):
        bound = 1.0 / math.sqrt(fan_in)
        w = jax.random.uniform(wkey, (fan_out, fan_in), jnp.float32, -bound, bound)
        b = jax.random.uniform(bkey, (fan_out,), jnp.float32, -bound, bound)
        return w, b

    wk, bk = lin(ks[0], ks[1], embed_dim, n_head * hidden_dim)
    wq, bq = lin(ks[2], ks[3], embed_dim, n_head * hidden_dim)
    wp, bp = lin(ks[4], ks[5], n_head * hidden_dim, out_dim)
    return {'w_k_weight': wk, 'w_k_bias': bk,
            'w_q_weight': wq, 'w_q_bias': bq,
            'proj_weight': wp, 'proj_bias': bp}


def attention_reference(k, q, params, *, mxu_bf16=False):
    cast = (lambda x: x.astype(jnp.bfloat16)) if mxu_bf16 else (lambda x: x)
    prec = None if mxu_bf16 else jax.lax.Precision.HIGHEST
    kx = jnp.matmul(cast(k), cast(params['w_k_weight'].T),
                    preferred_element_type=jnp.float32, precision=prec) + params['w_k_bias']
    qx = jnp.matmul(cast(q), cast(params['w_q_weight'].T),
                    preferred_element_type=jnp.float32, precision=prec) + params['w_q_bias']
    if mxu_bf16:
        kx = kx.astype(jnp.bfloat16)
        qx = qx.astype(jnp.bfloat16)
    score = jnp.einsum('bqh,bkh->bqk', qx, kx,
                       preferred_element_type=jnp.float32, precision=prec)
    score = jax.nn.softmax(score, axis=0)                    # dim=0 (batch)
    ctx = jnp.einsum('bqk,bkh->bqh', cast(score), kx,
                     preferred_element_type=jnp.float32, precision=prec)
    out = jnp.matmul(cast(ctx), cast(params['proj_weight'].T),
                     preferred_element_type=jnp.float32, precision=prec) + params['proj_bias']
    return out, score


def masked_edge_attention_ref(M, scalar_w, mask, mask_copy, *, mxu_bf16=False):
    if mxu_bf16:
        scale = jnp.einsum('sbd,md->sbm', M.astype(jnp.bfloat16),
                           scalar_w.astype(jnp.bfloat16),
                           preferred_element_type=jnp.float32)
    else:
        scale = jnp.einsum('sbd,md->sbm', M, scalar_w,
                           precision=jax.lax.Precision.HIGHEST)
    alpha = jax.nn.softmax(scale, axis=0)
    alpha = jnp.transpose(alpha, (1, 2, 0))                  # (B, Mx, S)
    masked = alpha * mask
    sums = jnp.sum(masked, axis=-1, keepdims=True)
    return masked / sums * mask_copy


if __name__ == "__main__":
    key = jax.random.PRNGKey(0)
    k1, k2, k3, k4, k5 = jax.random.split(key, 5)

    # ------------------ (A) MaskedEdgeAttention attn1 path ------------------
    S, B, D, MAXSEQ = 12, 2, 128, 16
    lengths = [12, 9]
    M = jax.random.normal(k1, (S, B, D), jnp.float32)
    bound = 1.0 / math.sqrt(D)
    scalar_w = jax.random.uniform(k2, (MAXSEQ, D), jnp.float32, -bound, bound)
    edge_ind = []
    for b in range(B):
        edges = []
        for node in range(lengths[b]):
            for nb in range(max(0, node - 2), min(lengths[b], node + 3)):
                edges.append((node, nb))
        edge_ind.append(edges)

    scores = masked_edge_attention_forward(M, scalar_w, edge_ind, lengths)
    jax.block_until_ready(scores)
    assert scores.shape == (B, MAXSEQ, S)

    mask_bms, maskc_bms = _build_edge_masks(edge_ind, B, MAXSEQ, S)
    r_bf = masked_edge_attention_ref(M, scalar_w, mask_bms, maskc_bms, mxu_bf16=True)
    r_f32 = masked_edge_attention_ref(M, scalar_w, mask_bms, maskc_bms, mxu_bf16=False)
    assert jnp.allclose(scores, r_bf, atol=5e-3, rtol=5e-3)
    assert jnp.allclose(scores, r_f32, atol=3e-2, rtol=3e-2)

    # --------- (B) Attention sub-module (dot_product, n_head=1) ------------
    mb, k_len, q_len, embed_dim = 2, 256, 512, 128
    n_head = 1
    hidden_dim = embed_dim // n_head
    out_dim = embed_dim

    params = init_params(k3, embed_dim, hidden_dim, out_dim, n_head)
    kk = jax.random.normal(k4, (mb, k_len, embed_dim), jnp.float32)
    qq = jax.random.normal(k5, (mb, q_len, embed_dim), jnp.float32)

    # MXU-width-aligned tiles so the demo exercises a (2, 2) grid
    # (parallel q tiles x K-reduction steps) without under-filling the MXU.
    out, score = attention_forward(kk, qq, params, n_head=n_head,
                                   q_tile=256, k_tile=128)
    jax.block_until_ready((out, score))
    assert out.shape == (mb, q_len, out_dim)
    assert score.shape == (mb, q_len, k_len)

    # Precision-matched reference (bf16 MXU operands, f32 accumulation).
    m_out, m_score = attention_reference(kk, qq, params, mxu_bf16=True)
    assert jnp.allclose(score.astype(jnp.float32), m_score, atol=3e-2, rtol=3e-2)
    assert jnp.allclose(out, m_out, atol=1e-1, rtol=5e-2)

    # Full-f32 reference (bounds the total bf16-path error).
    f_out, f_score = attention_reference(kk, qq, params, mxu_bf16=False)
    assert jnp.allclose(score.astype(jnp.float32), f_score, atol=8e-2, rtol=8e-2)
    assert jnp.allclose(out, f_out, atol=3.5e-1, rtol=1.2e-1)

    print("KERNEL_OK")
</pallas_src>

<mosaic_0001>
module attributes {stable_mosaic.version = 11 : i64} {
  func.func @_linear_kernel(%arg0: i32, %arg1: memref<24x128xbf16, #tpu.memory_space<vmem>>, %arg2: memref<128x16xbf16, #tpu.memory_space<vmem>>, %arg3: memref<1x16xf32, #tpu.memory_space<vmem>>, %arg4: memref<24x16xf32, #tpu.memory_space<vmem>>) attributes {dimension_semantics = [#tpu.dimension_semantics<parallel>], iteration_bounds = array<i64: 1>, scalar_prefetch = 0 : i64, scratch_operands = 0 : i64, tpu.core_type = #tpu.core_type<tc>, window_params = [{transform_indices = @transform_0, window_bounds = array<i64: 24, 128>}, {pipeline_mode = #tpu.pipeline_mode<synchronous>, transform_indices = @transform_1, window_bounds = array<i64: 128, 16>}, {pipeline_mode = #tpu.pipeline_mode<synchronous>, transform_indices = @transform_2, window_bounds = array<i64: 1, 16>}, {transform_indices = @transform_3, window_bounds = array<i64: 24, 16>}]} {
    %c0 = arith.constant 0 : index
    %c0_0 = arith.constant 0 : index
    %0 = vector.load %arg1[%c0, %c0_0] : memref<24x128xbf16, #tpu.memory_space<vmem>>, vector<24x128xbf16>
    %c0_1 = arith.constant 0 : index
    %c0_2 = arith.constant 0 : index
    %1 = vector.load %arg2[%c0_1, %c0_2] : memref<128x16xbf16, #tpu.memory_space<vmem>>, vector<128x16xbf16>
    %cst = arith.constant dense<0.000000e+00> : vector<24x16xf32>
    %2 = tpu.matmul %0, %1, %cst {dimension_numbers = #tpu.dot_dimension_numbers<[1], [0], [0], [1], [0, 0, 1, 1], [], []>} : vector<24x128xbf16>, vector<128x16xbf16>, vector<24x16xf32> -> vector<24x16xf32>
    %c0_3 = arith.constant 0 : index
    %c0_4 = arith.constant 0 : index
    %3 = vector.load %arg3[%c0_3, %c0_4] : memref<1x16xf32, #tpu.memory_space<vmem>>, vector<1x16xf32>
    %4 = vector.broadcast %3 : vector<1x16xf32> to vector<24x16xf32>
    %5 = arith.addf %2, %4 : vector<24x16xf32>
    %c0_5 = arith.constant 0 : index
    %c0_6 = arith.constant 0 : index
    %6 = vector.load %arg4[%c0_5, %c0_6] : memref<24x16xf32, #tpu.memory_space<vmem>>, vector<24x16xf32>
    tpu.vector_store %arg4[%c0_5, %c0_6], %5 {strides = array<i32>} : memref<24x16xf32, #tpu.memory_space<vmem>>, vector<24x16xf32>,
    return
  }
  func.func @transform_0(%arg0: i32) -> (i32, i32) {
    %c0_i32 = arith.constant 0 : i32
    %c0_i32_0 = arith.constant 0 : i32
    return %arg0, %c0_i32 : i32, i32
  }
  func.func @transform_1(%arg0: i32) -> (i32, i32) {
    %c0_i32 = arith.constant 0 : i32
    %c0_i32_0 = arith.constant 0 : i32
    %c0_i32_1 = arith.constant 0 : i32
    return %c0_i32, %c0_i32_0 : i32, i32
  }
  func.func @transform_2(%arg0: i32) -> (i32, i32) {
    %c0_i32 = arith.constant 0 : i32
    %c0_i32_0 = arith.constant 0 : i32
    %c0_i32_1 = arith.constant 0 : i32
    return %c0_i32, %c0_i32_0 : i32, i32
  }
  func.func @transform_3(%arg0: i32) -> (i32, i32) {
    %c0_i32 = arith.constant 0 : i32
    %c0_i32_0 = arith.constant 0 : i32
    return %arg0, %c0_i32 : i32, i32
  }
}

</mosaic_0001>

<bundles_post_ra>
// kernel: tpu_custom_call.1
= control target key start
LH: loop header
LB: loop body
LE: loop exit
PB: predicated region body
PF: predicated region fallthrough
CT: control target
= control target key end

     0   :  { %vm147_vm0 = vcmask 130048   ;;  %s268_s1 = inlined_call_operand.vmem [shape: bf16[128,16], index: 1, kind: input, shape index: {}]   ;;  %s269_s0 = inlined_call_operand.vmem [shape: bf16[24,128], index: 0, kind: input, shape index: {}]   ;;  %s270_s2 = inlined_call_operand.vmem [shape: f32[1,16], index: 2, kind: input, shape index: {}]   ;;  %s271_s3 = inlined_call_operand.vmem [shape: f32[24,16], index: 3, kind: output, shape index: {}]  }
   0x1   :  { %v196_v0 = vld [vmem:[%s268_s1 + $0x38] sm:$0xff]   ;;  %v197_v1 = vld [vmem:[%s268_s1 + $0x30] sm:$0xff]   ;;  %v198_v2 = vld [vmem:[%s268_s1 + $0x28] sm:$0xff]  }
   0x2   :  { %176 = vmatprep.subr.bf16.mxu0 %v196_v0  ;;  %v199_v3 = vld [vmem:[%s268_s1 + $0x20] sm:$0xff]   ;;  %v200_v5 = vld [vmem:[%s268_s1 + $0x18] sm:$0xff]   ;;  %v201_v6 = vld [vmem:[%s268_s1 + $0x10] sm:$0xff]  }
   0x3   :  { %177 = vmatpush3.bf16.msra.mxu0 %v196_v0  ;;  %v204_v4 = vld [vmem:[%s269_s0] sm:$0xff]   ;;  %v202_v7 = vld [vmem:[%s268_s1 + $0x8] sm:$0xff]  }
   0x4   :  { %178 = vmatprep.subr.bf16.mxu0 %v197_v1  ;;  %192 = vmatprep.mubr.bf16.mxu0 %v204_v4  ;;  %v203_v8 = vld [vmem:[%s268_s1] sm:$0xff]   ;;  %v205_v9 = vld [vmem:[%s269_s0 + $0x8] ss:$0 sps:$4 sm:$0xff]  }
   0x5   :  { %v155_v10 = vld [vmem:[%s270_s2] ss:$0 sm:$0xff] }
   0x7   :  { %179 = vmatpush3.bf16.msra.mxu0 %v197_v1 }
   0x8   :  { %180 = vmatprep.subr.bf16.mxu0 %v198_v2 }
   0xb   :  { %181 = vmatpush3.bf16.msra.mxu0 %v198_v2 }
   0xc   :  { %182 = vmatprep.subr.bf16.mxu0 %v199_v3 }
   0xf   :  { %183 = vmatpush3.bf16.msra.mxu0 %v199_v3 }
  0x10   :  { %184 = vmatprep.subr.bf16.mxu0 %v200_v5 }
  0x13   :  { %185 = vmatpush3.bf16.msra.mxu0 %v200_v5 }
  0x14   :  { %186 = vmatprep.subr.bf16.mxu0 %v201_v6 }
  0x17   :  { %187 = vmatpush3.bf16.msra.mxu0 %v201_v6 }
  0x18   :  { %188 = vmatprep.subr.bf16.mxu0 %v202_v7 }
  0x1b   :  { %189 = vmatpush3.bf16.msra.mxu0 %v202_v7 }
  0x1c   :  { %190 = vmatprep.subr.bf16.mxu0 %v203_v8 }
  0x1f   :  { %191 = vmatpush3.bf16.msra.mxu0 %v203_v8 }
  0x22   :  { %193 = vmatmul.mubr.bf16.vlgmr.msra.gmra.mxu0 %v205_v9 }
  0xe2   :  { %v194_v11 = vpop.f32.mrf.mxu0 }
  0xe3   :  { %v142_v12 = vadd.f32 %v194_v11, %v155_v10 }
  0xe4   :  { %v133_v13 = vpop.f32.mrf.mxu0 }
  0xe5   :  { %150 = vst.msk [vmem:[%s271_s3 + $0x10] sm:$0xff] %vm147_vm0, %v142_v12  ;;  %v134_v14 = vadd.f32 %v155_v10, %v133_v13 }
  0xe6   :  { %v195_v15 = vpop.f32.mrf.mxu0 }
  0xe7   :  { %148 = vst.msk [vmem:[%s271_s3] sm:$0xff] %vm147_vm0, %v134_v14 }
  0xe8   :  { %v136_v16 = vpop.f32.mrf.mxu0 }
  0xe9   :  { %v137_v17 = vadd.f32 %v155_v10, %v136_v16 }
  0xeb   :  { %149 = vst.msk [vmem:[%s271_s3 + $0x8] sm:$0xff] %vm147_vm0, %v137_v17 }

</bundles_post_ra>
